<compile_context>
chip_gen: v5e
topology: v5e:2x2
jax: 0.10.0
libtpu: 0.0.40
codegen_flags: <defaults>
</compile_context>

<pallas_src>
import jax
import jax.numpy as jnp
from jax.experimental import pallas as pl
from jax.experimental.pallas import tpu as pltpu


def _lstm_fc_kernel(x_ref, wih_ref, whh_ref, b_ref, wfc_ref, bfc_ref,
                    y_ref, hs_sc):
    seq_len = x_ref.shape[0]
    H = whh_ref.shape[0]

    # ---------- One-time prep (off the serial critical path) -------------
    # Batched input projection for all timesteps:
    #   (S, E) @ (E, 4H) + (1, 4H) -> (S, 4H)
    xw = (jnp.dot(x_ref[...], wih_ref[...],
                  preferred_element_type=jnp.float32)
          + b_ref[...])

    # tanh(x) = 2*sigmoid(2x) - 1:  double the g-gate (cell) columns of all
    # pre-activation terms once, so the per-step nonlinearity is a single
    # full-width sigmoid over (1, 4H).
    lane = jax.lax.broadcasted_iota(jnp.int32, (1, 4 * H), 1)
    g_cols = (lane >= 2 * H) & (lane < 3 * H)
    scale = jnp.where(g_cols, 2.0, 1.0).astype(jnp.float32)

    xw = xw * scale                                     # (S, 4H), one VPU pass
    whh = whh_ref[...] * scale                          # (H, 4H), loaded once

    h = jnp.zeros((1, H), jnp.float32)
    c = jnp.zeros((1, H), jnp.float32)                  # PyTorch zero (h0, c0)

    # ---------- Serial recurrence, fully unrolled at trace time ----------
    # (seq_len is a Python int; every slice/store below is static.)
    for t in range(seq_len):
        pre = xw[t:t + 1, :] + jnp.dot(h, whh,
                                       preferred_element_type=jnp.float32)
        act = jax.nn.sigmoid(pre)                       # ONE wide EUP pass
        # PyTorch gate ordering: input, forget, cell(g), output.
        i = act[:, 0 * H:1 * H]
        f = act[:, 1 * H:2 * H]
        g = 2.0 * act[:, 2 * H:3 * H] - 1.0             # == tanh(g_pre)
        o = act[:, 3 * H:4 * H]

        c = f * c + i * g
        h = o * jnp.tanh(c)                             # second EUP push/step
        hs_sc[t:t + 1, :] = h                           # off critical path

    # ---------- Deferred fused Linear over all hidden states -------------
    # (S, H) @ (H, O_pad) + (1, O_pad) -> lane-dense (S, O_pad) store.
    y_ref[...] = (jnp.dot(hs_sc[...], wfc_ref[...],
                          preferred_element_type=jnp.float32)
                  + bfc_ref[...]).astype(y_ref.dtype)


def lstm_module_forward(x, w_ih, w_hh, b_ih, b_hh, w_fc, b_fc):
    """x: (seq_len, embedding_dim) fp32. Returns (seq_len, 1, output_dim)."""
    seq_len, E = x.shape
    H = w_hh.shape[1]
    O = w_fc.shape[0]
    O_pad = ((O + 127) // 128) * 128                    # lane-dense output

    # One-time weight prep (would be folded into weight loading in practice).
    wih_t = w_ih.T                                      # (E, 4H)
    whh_t = w_hh.T                                      # (H, 4H)
    b = (b_ih + b_hh).reshape(1, 4 * H)                 # (1, 4H)
    wfc_t = jnp.zeros((H, O_pad), jnp.float32).at[:, :O].set(w_fc.T)
    bfc = jnp.zeros((1, O_pad), jnp.float32).at[:, :O].set(b_fc)

    vmem = pl.BlockSpec(memory_space=pltpu.MemorySpace.VMEM)

    y_pad = pl.pallas_call(
        _lstm_fc_kernel,
        out_shape=jax.ShapeDtypeStruct((seq_len, O_pad), jnp.float32),
        in_specs=[vmem] * 6,
        out_specs=vmem,
        scratch_shapes=[
            pltpu.VMEM((seq_len, H), jnp.float32),      # all hidden states h_t
        ],
    )(x, wih_t, whh_t, b, wfc_t, bfc)

    # Free layout plumbing outside the kernel: drop the lane padding and
    # recover PyTorch's (S, 1, O) shape.
    return y_pad[:, :O].reshape(seq_len, 1, O)


def _reference(x, w_ih, w_hh, b_ih, b_hh, w_fc, b_fc):
    """Pure-JAX reference matching torch.nn.LSTM + nn.Linear semantics."""
    H = w_hh.shape[1]

    def step(carry, xt):
        h, c = carry
        gates = xt @ w_ih.T + b_ih + h @ w_hh.T + b_hh
        i, f, g, o = jnp.split(gates, 4)
        i = jax.nn.sigmoid(i)
        f = jax.nn.sigmoid(f)
        g = jnp.tanh(g)
        o = jax.nn.sigmoid(o)
        c = f * c + i * g
        h = o * jnp.tanh(c)
        return (h, c), h

    _, hs = jax.lax.scan(step, (jnp.zeros(H), jnp.zeros(H)), x)
    y = hs @ w_fc.T + b_fc
    return y.reshape(x.shape[0], 1, -1)


if __name__ == "__main__":
    seq_len = 8
    embedding_dim = 32
    hidden_dim = 32
    output_dim = 16

    key = jax.random.PRNGKey(0)
    keys = jax.random.split(key, 8)
    k = 1.0 / jnp.sqrt(hidden_dim)   # PyTorch uniform init scale

    w_ih = jax.random.uniform(keys[0], (4 * hidden_dim, embedding_dim),
                              jnp.float32, -k, k)
    w_hh = jax.random.uniform(keys[1], (4 * hidden_dim, hidden_dim),
                              jnp.float32, -k, k)
    b_ih = jax.random.uniform(keys[2], (4 * hidden_dim,), jnp.float32, -k, k)
    b_hh = jax.random.uniform(keys[3], (4 * hidden_dim,), jnp.float32, -k, k)
    w_fc = jax.random.uniform(keys[4], (output_dim, hidden_dim),
                              jnp.float32, -k, k)
    b_fc = jax.random.uniform(keys[5], (output_dim,), jnp.float32, -k, k)

    x = jax.random.normal(keys[6], (seq_len, embedding_dim), jnp.float32)

    y = lstm_module_forward(x, w_ih, w_hh, b_ih, b_hh, w_fc, b_fc)
    y = jax.block_until_ready(y)

    y_ref = _reference(x, w_ih, w_hh, b_ih, b_hh, w_fc, b_fc)
    assert y.shape == (seq_len, 1, output_dim)
    assert jnp.allclose(y, y_ref, atol=1e-5, rtol=1e-5), "mismatch vs reference"

    print("KERNEL_OK")
</pallas_src>

<mosaic_0001>
module attributes {stable_mosaic.version = 11 : i64} {
  func.func @_lstm_fc_kernel(%arg0: memref<8x32xf32, #tpu.memory_space<vmem>>, %arg1: memref<32x128xf32, #tpu.memory_space<vmem>>, %arg2: memref<32x128xf32, #tpu.memory_space<vmem>>, %arg3: memref<1x128xf32, #tpu.memory_space<vmem>>, %arg4: memref<32x128xf32, #tpu.memory_space<vmem>>, %arg5: memref<1x128xf32, #tpu.memory_space<vmem>>, %arg6: memref<8x128xf32, #tpu.memory_space<vmem>>, %arg7: memref<8x32xf32, #tpu.memory_space<vmem>>) attributes {dimension_semantics = [], scalar_prefetch = 0 : i64, scratch_operands = 1 : i64, tpu.core_type = #tpu.core_type<tc>} {
    %c0 = arith.constant 0 : index
    %c0_0 = arith.constant 0 : index
    %0 = vector.load %arg0[%c0, %c0_0] : memref<8x32xf32, #tpu.memory_space<vmem>>, vector<8x32xf32>
    %c0_1 = arith.constant 0 : index
    %c0_2 = arith.constant 0 : index
    %1 = vector.load %arg1[%c0_1, %c0_2] : memref<32x128xf32, #tpu.memory_space<vmem>>, vector<32x128xf32>
    %cst = arith.constant dense<0.000000e+00> : vector<8x128xf32>
    %2 = tpu.matmul %0, %1, %cst {dimension_numbers = #tpu.dot_dimension_numbers<[1], [0], [0], [1], [0, 0, 1, 1], [], []>} : vector<8x32xf32>, vector<32x128xf32>, vector<8x128xf32> -> vector<8x128xf32>
    %c0_3 = arith.constant 0 : index
    %c0_4 = arith.constant 0 : index
    %3 = vector.load %arg3[%c0_3, %c0_4] : memref<1x128xf32, #tpu.memory_space<vmem>>, vector<1x128xf32>
    %4 = vector.broadcast %3 : vector<1x128xf32> to vector<8x128xf32>
    %5 = arith.addf %2, %4 : vector<8x128xf32>
    %6 = tpu.iota {dimensions = array<i32: 1>} : vector<1x128xi32>
    %c64_i32 = arith.constant 64 : i32
    %7 = vector.broadcast %c64_i32 : i32 to vector<1x128xi32>
    %8 = arith.cmpi sge, %6, %7 : vector<1x128xi32>
    %c96_i32 = arith.constant 96 : i32
    %9 = vector.broadcast %c96_i32 : i32 to vector<1x128xi32>
    %10 = arith.cmpi slt, %6, %9 : vector<1x128xi32>
    %11 = arith.andi %8, %10 : vector<1x128xi1>
    %cst_5 = arith.constant 2.000000e+00 : f32
    %cst_6 = arith.constant 1.000000e+00 : f32
    %12 = vector.broadcast %cst_5 : f32 to vector<1x128xf32>
    %13 = vector.broadcast %cst_6 : f32 to vector<1x128xf32>
    %14 = arith.select %11, %12, %13 : vector<1x128xi1>, vector<1x128xf32>
    %15 = vector.broadcast %14 : vector<1x128xf32> to vector<8x128xf32>
    %16 = arith.mulf %5, %15 : vector<8x128xf32>
    %c0_7 = arith.constant 0 : index
    %c0_8 = arith.constant 0 : index
    %17 = vector.load %arg2[%c0_7, %c0_8] : memref<32x128xf32, #tpu.memory_space<vmem>>, vector<32x128xf32>
    %18 = vector.broadcast %14 : vector<1x128xf32> to vector<32x128xf32>
    %19 = arith.mulf %17, %18 : vector<32x128xf32>
    %cst_9 = arith.constant 0.000000e+00 : f32
    %20 = vector.broadcast %cst_9 : f32 to vector<1x32xf32>
    %cst_10 = arith.constant 0.000000e+00 : f32
    %21 = vector.broadcast %cst_10 : f32 to vector<1x32xf32>
    %22 = vector.extract_strided_slice %16 {offsets = [0, 0], sizes = [1, 128], strides = [1, 1]} : vector<8x128xf32> to vector<1x128xf32>
    %cst_11 = arith.constant dense<0.000000e+00> : vector<1x128xf32>
    %23 = tpu.matmul %20, %19, %cst_11 {dimension_numbers = #tpu.dot_dimension_numbers<[1], [0], [0], [1], [0, 0, 1, 1], [], []>} : vector<1x32xf32>, vector<32x128xf32>, vector<1x128xf32> -> vector<1x128xf32>
    %24 = arith.addf %22, %23 : vector<1x128xf32>
    %25 = arith.negf %24 : vector<1x128xf32>
    %26 = math.exp %25 : vector<1x128xf32>
    %cst_12 = arith.constant 1.000000e+00 : f32
    %27 = vector.broadcast %cst_12 : f32 to vector<1x128xf32>
    %28 = arith.addf %27, %26 : vector<1x128xf32>
    %29 = arith.divf %27, %28 : vector<1x128xf32>
    %30 = vector.extract_strided_slice %29 {offsets = [0, 0], sizes = [1, 32], strides = [1, 1]} : vector<1x128xf32> to vector<1x32xf32>
    %31 = vector.extract_strided_slice %29 {offsets = [0, 32], sizes = [1, 32], strides = [1, 1]} : vector<1x128xf32> to vector<1x32xf32>
    %32 = vector.extract_strided_slice %29 {offsets = [0, 64], sizes = [1, 32], strides = [1, 1]} : vector<1x128xf32> to vector<1x32xf32>
    %cst_13 = arith.constant 2.000000e+00 : f32
    %33 = vector.broadcast %cst_13 : f32 to vector<1x32xf32>
    %34 = arith.mulf %33, %32 : vector<1x32xf32>
    %cst_14 = arith.constant 1.000000e+00 : f32
    %35 = vector.broadcast %cst_14 : f32 to vector<1x32xf32>
    %36 = arith.subf %34, %35 : vector<1x32xf32>
    %37 = vector.extract_strided_slice %29 {offsets = [0, 96], sizes = [1, 32], strides = [1, 1]} : vector<1x128xf32> to vector<1x32xf32>
    %38 = arith.mulf %31, %21 : vector<1x32xf32>
    %39 = arith.mulf %30, %36 : vector<1x32xf32>
    %40 = arith.addf %38, %39 : vector<1x32xf32>
    %41 = math.tanh %40 : vector<1x32xf32>
    %42 = arith.mulf %37, %41 : vector<1x32xf32>
    %c0_15 = arith.constant 0 : index
    %c0_16 = arith.constant 0 : index
    %43 = vector.load %arg7[%c0_15, %c0_16] : memref<8x32xf32, #tpu.memory_space<vmem>>, vector<1x32xf32>
    tpu.vector_store %arg7[%c0_15, %c0_16], %42 {strides = array<i32>} : memref<8x32xf32, #tpu.memory_space<vmem>>, vector<1x32xf32>,
    %44 = vector.extract_strided_slice %16 {offsets = [1, 0], sizes = [1, 128], strides = [1, 1]} : vector<8x128xf32> to vector<1x128xf32>
    %cst_17 = arith.constant dense<0.000000e+00> : vector<1x128xf32>
    %45 = tpu.matmul %42, %19, %cst_17 {dimension_numbers = #tpu.dot_dimension_numbers<[1], [0], [0], [1], [0, 0, 1, 1], [], []>} : vector<1x32xf32>, vector<32x128xf32>, vector<1x128xf32> -> vector<1x128xf32>
    %46 = arith.addf %44, %45 : vector<1x128xf32>
    %47 = arith.negf %46 : vector<1x128xf32>
    %48 = math.exp %47 : vector<1x128xf32>
    %cst_18 = arith.constant 1.000000e+00 : f32
    %49 = vector.broadcast %cst_18 : f32 to vector<1x128xf32>
    %50 = arith.addf %49, %48 : vector<1x128xf32>
    %51 = arith.divf %49, %50 : vector<1x128xf32>
    %52 = vector.extract_strided_slice %51 {offsets = [0, 0], sizes = [1, 32], strides = [1, 1]} : vector<1x128xf32> to vector<1x32xf32>
    %53 = vector.extract_strided_slice %51 {offsets = [0, 32], sizes = [1, 32], strides = [1, 1]} : vector<1x128xf32> to vector<1x32xf32>
    %54 = vector.extract_strided_slice %51 {offsets = [0, 64], sizes = [1, 32], strides = [1, 1]} : vector<1x128xf32> to vector<1x32xf32>
    %cst_19 = arith.constant 2.000000e+00 : f32
    %55 = vector.broadcast %cst_19 : f32 to vector<1x32xf32>
    %56 = arith.mulf %55, %54 : vector<1x32xf32>
    %cst_20 = arith.constant 1.000000e+00 : f32
    %57 = vector.broadcast %cst_20 : f32 to vector<1x32xf32>
    %58 = arith.subf %56, %57 : vector<1x32xf32>
    %59 = vector.extract_strided_slice %51 {offsets = [0, 96], sizes = [1, 32], strides = [1, 1]} : vector<1x128xf32> to vector<1x32xf32>
    %60 = arith.mulf %53, %40 : vector<1x32xf32>
    %61 = arith.mulf %52, %58 : vector<1x32xf32>
    %62 = arith.addf %60, %61 : vector<1x32xf32>
    %63 = math.tanh %62 : vector<1x32xf32>
    %64 = arith.mulf %59, %63 : vector<1x32xf32>
    %c1 = arith.constant 1 : index
    %c0_21 = arith.constant 0 : index
    %65 = vector.load %arg7[%c1, %c0_21] : memref<8x32xf32, #tpu.memory_space<vmem>>, vector<1x32xf32>
    tpu.vector_store %arg7[%c1, %c0_21], %64 {strides = array<i32>} : memref<8x32xf32, #tpu.memory_space<vmem>>, vector<1x32xf32>,
    %66 = vector.extract_strided_slice %16 {offsets = [2, 0], sizes = [1, 128], strides = [1, 1]} : vector<8x128xf32> to vector<1x128xf32>
    %cst_22 = arith.constant dense<0.000000e+00> : vector<1x128xf32>
    %67 = tpu.matmul %64, %19, %cst_22 {dimension_numbers = #tpu.dot_dimension_numbers<[1], [0], [0], [1], [0, 0, 1, 1], [], []>} : vector<1x32xf32>, vector<32x128xf32>, vector<1x128xf32> -> vector<1x128xf32>
    %68 = arith.addf %66, %67 : vector<1x128xf32>
    %69 = arith.negf %68 : vector<1x128xf32>
    %70 = math.exp %69 : vector<1x128xf32>
    %cst_23 = arith.constant 1.000000e+00 : f32
    %71 = vector.broadcast %cst_23 : f32 to vector<1x128xf32>
    %72 = arith.addf %71, %70 : vector<1x128xf32>
    %73 = arith.divf %71, %72 : vector<1x128xf32>
    %74 = vector.extract_strided_slice %73 {offsets = [0, 0], sizes = [1, 32], strides = [1, 1]} : vector<1x128xf32> to vector<1x32xf32>
    %75 = vector.extract_strided_slice %73 {offsets = [0, 32], sizes = [1, 32], strides = [1, 1]} : vector<1x128xf32> to vector<1x32xf32>
    %76 = vector.extract_strided_slice %73 {offsets = [0, 64], sizes = [1, 32], strides = [1, 1]} : vector<1x128xf32> to vector<1x32xf32>
    %cst_24 = arith.constant 2.000000e+00 : f32
    %77 = vector.broadcast %cst_24 : f32 to vector<1x32xf32>
    %78 = arith.mulf %77, %76 : vector<1x32xf32>
    %cst_25 = arith.constant 1.000000e+00 : f32
    %79 = vector.broadcast %cst_25 : f32 to vector<1x32xf32>
    %80 = arith.subf %78, %79 : vector<1x32xf32>
    %81 = vector.extract_strided_slice %73 {offsets = [0, 96], sizes = [1, 32], strides = [1, 1]} : vector<1x128xf32> to vector<1x32xf32>
    %82 = arith.mulf %75, %62 : vector<1x32xf32>
    %83 = arith.mulf %74, %80 : vector<1x32xf32>
    %84 = arith.addf %82, %83 : vector<1x32xf32>
    %85 = math.tanh %84 : vector<1x32xf32>
    %86 = arith.mulf %81, %85 : vector<1x32xf32>
    %c2 = arith.constant 2 : index
    %c0_26 = arith.constant 0 : index
    %87 = vector.load %arg7[%c2, %c0_26] : memref<8x32xf32, #tpu.memory_space<vmem>>, vector<1x32xf32>
    tpu.vector_store %arg7[%c2, %c0_26], %86 {strides = array<i32>} : memref<8x32xf32, #tpu.memory_space<vmem>>, vector<1x32xf32>,
    %88 = vector.extract_strided_slice %16 {offsets = [3, 0], sizes = [1, 128], strides = [1, 1]} : vector<8x128xf32> to vector<1x128xf32>
    %cst_27 = arith.constant dense<0.000000e+00> : vector<1x128xf32>
    %89 = tpu.matmul %86, %19, %cst_27 {dimension_numbers = #tpu.dot_dimension_numbers<[1], [0], [0], [1], [0, 0, 1, 1], [], []>} : vector<1x32xf32>, vector<32x128xf32>, vector<1x128xf32> -> vector<1x128xf32>
    %90 = arith.addf %88, %89 : vector<1x128xf32>
    %91 = arith.negf %90 : vector<1x128xf32>
    %92 = math.exp %91 : vector<1x128xf32>
    %cst_28 = arith.constant 1.000000e+00 : f32
    %93 = vector.broadcast %cst_28 : f32 to vector<1x128xf32>
    %94 = arith.addf %93, %92 : vector<1x128xf32>
    %95 = arith.divf %93, %94 : vector<1x128xf32>
    %96 = vector.extract_strided_slice %95 {offsets = [0, 0], sizes = [1, 32], strides = [1, 1]} : vector<1x128xf32> to vector<1x32xf32>
    %97 = vector.extract_strided_slice %95 {offsets = [0, 32], sizes = [1, 32], strides = [1, 1]} : vector<1x128xf32> to vector<1x32xf32>
    %98 = vector.extract_strided_slice %95 {offsets = [0, 64], sizes = [1, 32], strides = [1, 1]} : vector<1x128xf32> to vector<1x32xf32>
    %cst_29 = arith.constant 2.000000e+00 : f32
    %99 = vector.broadcast %cst_29 : f32 to vector<1x32xf32>
    %100 = arith.mulf %99, %98 : vector<1x32xf32>
    %cst_30 = arith.constant 1.000000e+00 : f32
    %101 = vector.broadcast %cst_30 : f32 to vector<1x32xf32>
    %102 = arith.subf %100, %101 : vector<1x32xf32>
    %103 = vector.extract_strided_slice %95 {offsets = [0, 96], sizes = [1, 32], strides = [1, 1]} : vector<1x128xf32> to vector<1x32xf32>
    %104 = arith.mulf %97, %84 : vector<1x32xf32>
    %105 = arith.mulf %96, %102 : vector<1x32xf32>
    %106 = arith.addf %104, %105 : vector<1x32xf32>
    %107 = math.tanh %106 : vector<1x32xf32>
    %108 = arith.mulf %103, %107 : vector<1x32xf32>
    %c3 = arith.constant 3 : index
    %c0_31 = arith.constant 0 : index
    %109 = vector.load %arg7[%c3, %c0_31] : memref<8x32xf32, #tpu.memory_space<vmem>>, vector<1x32xf32>
    tpu.vector_store %arg7[%c3, %c0_31], %108 {strides = array<i32>} : memref<8x32xf32, #tpu.memory_space<vmem>>, vector<1x32xf32>,
    %110 = vector.extract_strided_slice %16 {offsets = [4, 0], sizes = [1, 128], strides = [1, 1]} : vector<8x128xf32> to vector<1x128xf32>
    %cst_32 = arith.constant dense<0.000000e+00> : vector<1x128xf32>
    %111 = tpu.matmul %108, %19, %cst_32 {dimension_numbers = #tpu.dot_dimension_numbers<[1], [0], [0], [1], [0, 0, 1, 1], [], []>} : vector<1x32xf32>, vector<32x128xf32>, vector<1x128xf32> -> vector<1x128xf32>
    %112 = arith.addf %110, %111 : vector<1x128xf32>
    %113 = arith.negf %112 : vector<1x128xf32>
    %114 = math.exp %113 : vector<1x128xf32>
    %cst_33 = arith.constant 1.000000e+00 : f32
    %115 = vector.broadcast %cst_33 : f32 to vector<1x128xf32>
    %116 = arith.addf %115, %114 : vector<1x128xf32>
    %117 = arith.divf %115, %116 : vector<1x128xf32>
    %118 = vector.extract_strided_slice %117 {offsets = [0, 0], sizes = [1, 32], strides = [1, 1]} : vector<1x128xf32> to vector<1x32xf32>
    %119 = vector.extract_strided_slice %117 {offsets = [0, 32], sizes = [1, 32], strides = [1, 1]} : vector<1x128xf32> to vector<1x32xf32>
    %120 = vector.extract_strided_slice %117 {offsets = [0, 64], sizes = [1, 32], strides = [1, 1]} : vector<1x128xf32> to vector<1x32xf32>
    %cst_34 = arith.constant 2.000000e+00 : f32
    %121 = vector.broadcast %cst_34 : f32 to vector<1x32xf32>
    %122 = arith.mulf %121, %120 : vector<1x32xf32>
    %cst_35 = arith.constant 1.000000e+00 : f32
    %123 = vector.broadcast %cst_35 : f32 to vector<1x32xf32>
    %124 = arith.subf %122, %123 : vector<1x32xf32>
    %125 = vector.extract_strided_slice %117 {offsets = [0, 96], sizes = [1, 32], strides = [1, 1]} : vector<1x128xf32> to vector<1x32xf32>
    %126 = arith.mulf %119, %106 : vector<1x32xf32>
    %127 = arith.mulf %118, %124 : vector<1x32xf32>
    %128 = arith.addf %126, %127 : vector<1x32xf32>
    %129 = math.tanh %128 : vector<1x32xf32>
    %130 = arith.mulf %125, %129 : vector<1x32xf32>
    %c4 = arith.constant 4 : index
    %c0_36 = arith.constant 0 : index
    %131 = vector.load %arg7[%c4, %c0_36] : memref<8x32xf32, #tpu.memory_space<vmem>>, vector<1x32xf32>
    tpu.vector_store %arg7[%c4, %c0_36], %130 {strides = array<i32>} : memref<8x32xf32, #tpu.memory_space<vmem>>, vector<1x32xf32>,
    %132 = vector.extract_strided_slice %16 {offsets = [5, 0], sizes = [1, 128], strides = [1, 1]} : vector<8x128xf32> to vector<1x128xf32>
    %cst_37 = arith.constant dense<0.000000e+00> : vector<1x128xf32>
    %133 = tpu.matmul %130, %19, %cst_37 {dimension_numbers = #tpu.dot_dimension_numbers<[1], [0], [0], [1], [0, 0, 1, 1], [], []>} : vector<1x32xf32>, vector<32x128xf32>, vector<1x128xf32> -> vector<1x128xf32>
    %134 = arith.addf %132, %133 : vector<1x128xf32>
    %135 = arith.negf %134 : vector<1x128xf32>
    %136 = math.exp %135 : vector<1x128xf32>
    %cst_38 = arith.constant 1.000000e+00 : f32
    %137 = vector.broadcast %cst_38 : f32 to vector<1x128xf32>
    %138 = arith.addf %137, %136 : vector<1x128xf32>
    %139 = arith.divf %137, %138 : vector<1x128xf32>
    %140 = vector.extract_strided_slice %139 {offsets = [0, 0], sizes = [1, 32], strides = [1, 1]} : vector<1x128xf32> to vector<1x32xf32>
    %141 = vector.extract_strided_slice %139 {offsets = [0, 32], sizes = [1, 32], strides = [1, 1]} : vector<1x128xf32> to vector<1x32xf32>
    %142 = vector.extract_strided_slice %139 {offsets = [0, 64], sizes = [1, 32], strides = [1, 1]} : vector<1x128xf32> to vector<1x32xf32>
    %cst_39 = arith.constant 2.000000e+00 : f32
    %143 = vector.broadcast %cst_39 : f32 to vector<1x32xf32>
    %144 = arith.mulf %143, %142 : vector<1x32xf32>
    %cst_40 = arith.constant 1.000000e+00 : f32
    %145 = vector.broadcast %cst_40 : f32 to vector<1x32xf32>
    %146 = arith.subf %144, %145 : vector<1x32xf32>
    %147 = vector.extract_strided_slice %139 {offsets = [0, 96], sizes = [1, 32], strides = [1, 1]} : vector<1x128xf32> to vector<1x32xf32>
    %148 = arith.mulf %141, %128 : vector<1x32xf32>
    %149 = arith.mulf %140, %146 : vector<1x32xf32>
    %150 = arith.addf %148, %149 : vector<1x32xf32>
    %151 = math.tanh %150 : vector<1x32xf32>
    %152 = arith.mulf %147, %151 : vector<1x32xf32>
    %c5 = arith.constant 5 : index
    %c0_41 = arith.constant 0 : index
    %153 = vector.load %arg7[%c5, %c0_41] : memref<8x32xf32, #tpu.memory_space<vmem>>, vector<1x32xf32>
    tpu.vector_store %arg7[%c5, %c0_41], %152 {strides = array<i32>} : memref<8x32xf32, #tpu.memory_space<vmem>>, vector<1x32xf32>,
    %154 = vector.extract_strided_slice %16 {offsets = [6, 0], sizes = [1, 128], strides = [1, 1]} : vector<8x128xf32> to vector<1x128xf32>
    %cst_42 = arith.constant dense<0.000000e+00> : vector<1x128xf32>
    %155 = tpu.matmul %152, %19, %cst_42 {dimension_numbers = #tpu.dot_dimension_numbers<[1], [0], [0], [1], [0, 0, 1, 1], [], []>} : vector<1x32xf32>, vector<32x128xf32>, vector<1x128xf32> -> vector<1x128xf32>
    %156 = arith.addf %154, %155 : vector<1x128xf32>
    %157 = arith.negf %156 : vector<1x128xf32>
    %158 = math.exp %157 : vector<1x128xf32>
    %cst_43 = arith.constant 1.000000e+00 : f32
    %159 = vector.broadcast %cst_43 : f32 to vector<1x128xf32>
    %160 = arith.addf %159, %158 : vector<1x128xf32>
    %161 = arith.divf %159, %160 : vector<1x128xf32>
    %162 = vector.extract_strided_slice %161 {offsets = [0, 0], sizes = [1, 32], strides = [1, 1]} : vector<1x128xf32> to vector<1x32xf32>
    %163 = vector.extract_strided_slice %161 {offsets = [0, 32], sizes = [1, 32], strides = [1, 1]} : vector<1x128xf32> to vector<1x32xf32>
    %164 = vector.extract_strided_slice %161 {offsets = [0, 64], sizes = [1, 32], strides = [1, 1]} : vector<1x128xf32> to vector<1x32xf32>
    %cst_44 = arith.constant 2.000000e+00 : f32
    %165 = vector.broadcast %cst_44 : f32 to vector<1x32xf32>
    %166 = arith.mulf %165, %164 : vector<1x32xf32>
    %cst_45 = arith.constant 1.000000e+00 : f32
    %167 = vector.broadcast %cst_45 : f32 to vector<1x32xf32>
    %168 = arith.subf %166, %167 : vector<1x32xf32>
    %169 = vector.extract_strided_slice %161 {offsets = [0, 96], sizes = [1, 32], strides = [1, 1]} : vector<1x128xf32> to vector<1x32xf32>
    %170 = arith.mulf %163, %150 : vector<1x32xf32>
    %171 = arith.mulf %162, %168 : vector<1x32xf32>
    %172 = arith.addf %170, %171 : vector<1x32xf32>
    %173 = math.tanh %172 : vector<1x32xf32>
    %174 = arith.mulf %169, %173 : vector<1x32xf32>
    %c6 = arith.constant 6 : index
    %c0_46 = arith.constant 0 : index
    %175 = vector.load %arg7[%c6, %c0_46] : memref<8x32xf32, #tpu.memory_space<vmem>>, vector<1x32xf32>
    tpu.vector_store %arg7[%c6, %c0_46], %174 {strides = array<i32>} : memref<8x32xf32, #tpu.memory_space<vmem>>, vector<1x32xf32>,
    %176 = vector.extract_strided_slice %16 {offsets = [7, 0], sizes = [1, 128], strides = [1, 1]} : vector<8x128xf32> to vector<1x128xf32>
    %cst_47 = arith.constant dense<0.000000e+00> : vector<1x128xf32>
    %177 = tpu.matmul %174, %19, %cst_47 {dimension_numbers = #tpu.dot_dimension_numbers<[1], [0], [0], [1], [0, 0, 1, 1], [], []>} : vector<1x32xf32>, vector<32x128xf32>, vector<1x128xf32> -> vector<1x128xf32>
    %178 = arith.addf %176, %177 : vector<1x128xf32>
    %179 = arith.negf %178 : vector<1x128xf32>
    %180 = math.exp %179 : vector<1x128xf32>
    %cst_48 = arith.constant 1.000000e+00 : f32
    %181 = vector.broadcast %cst_48 : f32 to vector<1x128xf32>
    %182 = arith.addf %181, %180 : vector<1x128xf32>
    %183 = arith.divf %181, %182 : vector<1x128xf32>
    %184 = vector.extract_strided_slice %183 {offsets = [0, 0], sizes = [1, 32], strides = [1, 1]} : vector<1x128xf32> to vector<1x32xf32>
    %185 = vector.extract_strided_slice %183 {offsets = [0, 32], sizes = [1, 32], strides = [1, 1]} : vector<1x128xf32> to vector<1x32xf32>
    %186 = vector.extract_strided_slice %183 {offsets = [0, 64], sizes = [1, 32], strides = [1, 1]} : vector<1x128xf32> to vector<1x32xf32>
    %cst_49 = arith.constant 2.000000e+00 : f32
    %187 = vector.broadcast %cst_49 : f32 to vector<1x32xf32>
    %188 = arith.mulf %187, %186 : vector<1x32xf32>
    %cst_50 = arith.constant 1.000000e+00 : f32
    %189 = vector.broadcast %cst_50 : f32 to vector<1x32xf32>
    %190 = arith.subf %188, %189 : vector<1x32xf32>
    %191 = vector.extract_strided_slice %183 {offsets = [0, 96], sizes = [1, 32], strides = [1, 1]} : vector<1x128xf32> to vector<1x32xf32>
    %192 = arith.mulf %185, %172 : vector<1x32xf32>
    %193 = arith.mulf %184, %190 : vector<1x32xf32>
    %194 = arith.addf %192, %193 : vector<1x32xf32>
    %195 = math.tanh %194 : vector<1x32xf32>
    %196 = arith.mulf %191, %195 : vector<1x32xf32>
    %c7 = arith.constant 7 : index
    %c0_51 = arith.constant 0 : index
    %197 = vector.load %arg7[%c7, %c0_51] : memref<8x32xf32, #tpu.memory_space<vmem>>, vector<1x32xf32>
    tpu.vector_store %arg7[%c7, %c0_51], %196 {strides = array<i32>} : memref<8x32xf32, #tpu.memory_space<vmem>>, vector<1x32xf32>,
    %c0_52 = arith.constant 0 : index
    %c0_53 = arith.constant 0 : index
    %198 = vector.load %arg7[%c0_52, %c0_53] : memref<8x32xf32, #tpu.memory_space<vmem>>, vector<8x32xf32>
    %c0_54 = arith.constant 0 : index
    %c0_55 = arith.constant 0 : index
    %199 = vector.load %arg4[%c0_54, %c0_55] : memref<32x128xf32, #tpu.memory_space<vmem>>, vector<32x128xf32>
    %cst_56 = arith.constant dense<0.000000e+00> : vector<8x128xf32>
    %200 = tpu.matmul %198, %199, %cst_56 {dimension_numbers = #tpu.dot_dimension_numbers<[1], [0], [0], [1], [0, 0, 1, 1], [], []>} : vector<8x32xf32>, vector<32x128xf32>, vector<8x128xf32> -> vector<8x128xf32>
    %c0_57 = arith.constant 0 : index
    %c0_58 = arith.constant 0 : index
    %201 = vector.load %arg5[%c0_57, %c0_58] : memref<1x128xf32, #tpu.memory_space<vmem>>, vector<1x128xf32>
    %202 = vector.broadcast %201 : vector<1x128xf32> to vector<8x128xf32>
    %203 = arith.addf %200, %202 : vector<8x128xf32>
    %c0_59 = arith.constant 0 : index
    %c0_60 = arith.constant 0 : index
    %204 = vector.load %arg6[%c0_59, %c0_60] : memref<8x128xf32, #tpu.memory_space<vmem>>, vector<8x128xf32>
    tpu.vector_store %arg6[%c0_59, %c0_60], %203 {strides = array<i32>} : memref<8x128xf32, #tpu.memory_space<vmem>>, vector<8x128xf32>,
    return
  }
}

</mosaic_0001>

<bundles_post_ra>
// kernel: tpu_custom_call.1
= control target key start
LH: loop header
LB: loop body
LE: loop exit
PB: predicated region body
PF: predicated region fallthrough
CT: control target
= control target key end

     0   :  { %11 = vsyncpa [#allocation4], 0  ;;  %s1140_s0 = inlined_call_operand.hbm [shape: f32[8,32], index: 0, kind: input, shape index: {}]   ;;  %s1141_s1 = inlined_call_operand.hbm [shape: f32[32,128], index: 1, kind: input, shape index: {}]   ;;  %s1142_s2 = inlined_call_operand.hbm [shape: f32[32,128], index: 2, kind: input, shape index: {}]   ;;  %s1143_s3 = inlined_call_operand.vmem [shape: f32[1,128], index: 3, kind: input, shape index: {}]   ;;  %s1144_s4 = inlined_call_operand.hbm [shape: f32[32,128], index: 4, kind: input, shape index: {}]   ;;  %s1145_s5 = inlined_call_operand.vmem [shape: f32[1,128], index: 5, kind: input, shape index: {}]   ;;  %s1146_s6 = inlined_call_operand.hbm [shape: f32[8,128], index: 6, kind: output, shape index: {}]  }
   0x1   :  { %12 = vsyncpa [#allocation7], 0 }
   0x2   :  { %13 = vsyncpa [#allocation10], 0  ;;  %s30_s23 = sshll.u32 %s1141_s1, 4  ;;  %s31_s23 = int_to_ptr.hbm [resolvable:$true] %s30_s23 }
   0x3   :  { %14 = vsyncpa [#allocation5], 0  ;;  %s996_s24 = smov [#allocation6]   ;;  %s20_s28 = sshll.u32 %s1140_s0, 4  ;;  %s21_s28 = int_to_ptr.hbm [resolvable:$true] %s20_s28 }
   0x4   :  { %s32_s25 = sshll.u32 %s996_s24, 4  ;;  %s997_s29 = smov 128   ;;  %s33_s25 = int_to_ptr.vmem [resolvable:$true] %s32_s25 }
   0x5   :  { %s998_s30 = smov 8   ;;  %s999_s7 = smov [#allocation3]  }
   0x6   :  { %38 = dma.hbm_to_vmem [thread:$0]  %s31_s23, 512, %s33_s25, [#allocation7], %s997_s29, %s997_s29, %s998_s30  }
   0x7   :  { %s22_s8 = sshll.u32 %s999_s7, 4  ;;  %s43_s11 = sshll.u32 %s1142_s2, 4  ;;  %s23_s8 = int_to_ptr.vmem [resolvable:$true] %s22_s8  ;;  %s44_s11 = int_to_ptr.hbm [resolvable:$true] %s43_s11 }
   0x8   :  { %25 = dma.hbm_to_vmem [thread:$0]  %s21_s28, 128, %s23_s8, [#allocation4]  }
   0x9   :  { %s58_s13 = sshll.u32 %s1144_s4, 4  ;;  %s1000_s14 = smov [#allocation8]   ;;  %s59_s13 = int_to_ptr.hbm [resolvable:$true] %s58_s13 }
   0xa   :  { %s45_s15 = sshll.u32 %s1000_s14, 4  ;;  %s1001_s0 = smov [#allocation9]   ;;  %s46_s15 = int_to_ptr.vmem [resolvable:$true] %s45_s15 }
   0xb   :  { %51 = dma.hbm_to_vmem [thread:$0]  %s44_s11, 512, %s46_s15, [#allocation7], %s997_s29, %s997_s29, %s998_s30  }
   0xc   :  { %s60_s16 = sshll.u32 %s1001_s0, 4  ;;  %s61_s16 = int_to_ptr.vmem [resolvable:$true] %s60_s16 }
   0xd   :  { %66 = dma.hbm_to_vmem [thread:$0]  %s59_s13, 512, %s61_s16, [#allocation10], %s997_s29, %s997_s29, %s998_s30  }
   0xe   :  { %988 = dma.done.wait [#allocation4], 128  }
   0xf   :  { %989 = vsyncadd [#allocation4], 4294967168 }
  0x10   :  { %990 = dma.done.wait [#allocation7], 1024  }
  0x11   :  { %991 = vsyncadd [#allocation7], 4294966272 }
  0x12   :  { %992 = dma.done.wait [#allocation10], 512  }
  0x13   :  { %993 = vsyncadd [#allocation10], 4294966784  ;;  %v118_v0 = vlaneseq  ;;  %v1002_v2 = vmov 1.0   ;;  %v89_v4 = vld [vmem:[#allocation6 + $0x18] sm:$0xff]  ;;  %v88_v5 = vld [vmem:[#allocation6 + $0x10] sm:$0xff]  ;;  %vm94_vm3 = vcmask 261120  }
  0x14   :  { %110 = vmatpush.msra.mxu0 %v89_v4  ;;  %v128_v6 = vld [vmem:[#allocation8 + $0x18] sm:$0xff]  ;;  %v127_v7 = vld [vmem:[#allocation8 + $0x10] sm:$0xff]  ;;  %v87_v8 = vld [vmem:[#allocation6 + $0x8] sm:$0xff]  ;;  %v1003_v17 = vmov 0.0   ;;  %s1005_s17 = smov 32   ;;  %vm199_vm8 = vcmask 253952  }
  0x15   :  { %v119_v1 = vand.u32 127, %v118_v0  ;;  %v126_v11 = vld [vmem:[#allocation8 + $0x8] sm:$0xff]  ;;  %v125_v12 = vld [vmem:[#allocation8] sm:$0xff]  ;;  %v85_v15 = vld [vmem:[#allocation3] sm:$0xff]  ;;  %s1006_s20 = smov [#allocation11]   ;;  %s770_s24 = sshll.u32 %s1146_s6, 4  ;;  %s771_s24 = int_to_ptr.hbm [resolvable:$true] %s770_s24 }
  0x16   :  { %111 = vmatpush.msra.mxu0 %v88_v5  ;;  %v86_v13 = vld [vmem:[#allocation6] sm:$0xff]  ;;  %v818_v18 = vld [vmem:[%s1143_s3] ss:$0 sm:$0xff]  ;;  %s1004_s3 = smov 64   ;;  %s768_s21 = sshll.u32 %s1006_s20, 4  ;;  %s769_s21 = int_to_ptr.vmem [resolvable:$true] %s768_s21 }
  0x17   :  { %vm120_vm0 = vcmp.ge.s32.totalorder %v119_v1, 64  ;;  %vm121_vm1 = vcmp.lt.s32.totalorder %v119_v1, 96 }
  0x18   :  { %vm122_vm2 = vmand %vm120_vm0, %vm121_vm1  ;;  %112 = vmatpush.msra.mxu0 %v87_v8 }
  0x19   :  { %v123_v3 = vsel %vm122_vm2, 2.0, %v1002_v2 }
  0x1a   :  { %v132_v9 = vmul.f32 %v128_v6, %v123_v3  ;;  %v131_v10 = vmul.f32 %v127_v7, %v123_v3  ;;  %v130_v14 = vmul.f32 %v126_v11, %v123_v3  ;;  %v129_v16 = vmul.f32 %v125_v12, %v123_v3  ;;  %113 = vmatpush.msra.mxu0 %v86_v13 }
  0x1b   :  { %782 = vmatmul.msk.f32.vlgmr.msra.gmra.mxu0 %vm94_vm3, %v85_v15 }
  0x1c   :  { %148 = vmatpush.msra.mxu1 %v132_v9  ;;  %215 = vmatpush.msra.mxu2 %v132_v9 }
  0x1d   :  { %291 = vmatpush.msra.mxu3 %v132_v9  ;;  %367 = vmatpush.msrb.mxu0 %v132_v9 }
  0x1e   :  { %149 = vmatpush.msra.mxu1 %v131_v10  ;;  %216 = vmatpush.msra.mxu2 %v131_v10 }
  0x1f   :  { %292 = vmatpush.msra.mxu3 %v131_v10  ;;  %368 = vmatpush.msrb.mxu0 %v131_v10 }
  0x20   :  { %150 = vmatpush.msra.mxu1 %v130_v14  ;;  %217 = vmatpush.msra.mxu2 %v130_v14 }
  0x21   :  { %293 = vmatpush.msra.mxu3 %v130_v14  ;;  %369 = vmatpush.msrb.mxu0 %v130_v14 }
  0x22   :  { %151 = vmatpush.msra.mxu1 %v129_v16  ;;  %218 = vmatpush.msra.mxu2 %v129_v16 }
  0x23   :  { %152 = vmatmul.f32.vlgmr.msra.gmra.mxu1 %v1003_v17  ;;  %294 = vmatpush.msra.mxu3 %v129_v16 }
  0x24   :  { %443 = vmatpush.msrb.mxu1 %v132_v9  ;;  %519 = vmatpush.msrb.mxu2 %v132_v9 }
  0x25   :  { %595 = vmatpush.msrb.mxu3 %v132_v9  ;;  %370 = vmatpush.msrb.mxu0 %v129_v16 }
  0x26   :  { %444 = vmatpush.msrb.mxu1 %v131_v10  ;;  %520 = vmatpush.msrb.mxu2 %v131_v10 }
  0x27   :  { %596 = vmatpush.msrb.mxu3 %v131_v10  ;;  %671 = vmatpush.msra.mxu0 %v132_v9 }
  0x28   :  { %445 = vmatpush.msrb.mxu1 %v130_v14  ;;  %521 = vmatpush.msrb.mxu2 %v130_v14 }
  0x29   :  { %597 = vmatpush.msrb.mxu3 %v130_v14  ;;  %672 = vmatpush.msra.mxu0 %v131_v10 }
  0x2a   :  { %446 = vmatpush.msrb.mxu1 %v129_v16  ;;  %522 = vmatpush.msrb.mxu2 %v129_v16 }
  0x2b   :  { %598 = vmatpush.msrb.mxu3 %v129_v16  ;;  %673 = vmatpush.msra.mxu0 %v130_v14 }
  0x2d   :  { %674 = vmatpush.msra.mxu0 %v129_v16 }
  0x98   :  { %v115_v19 = vpop.f32.mrf.mxu0 }
  0x99   :  { %v116_v20 = vadd.f32 %v818_v18, %v115_v19 }
  0x9b   :  { %v1058_v21 = vmul.f32 %v123_v3, %v116_v20 }
  0xa0   :  { %v153_v22 = vpop.f32.mrf.mxu1 }
  0xa1   :  { %v156_v23 = vadd.f32 %v153_v22, %v1058_v21 }
  0xa3   :  { %v783_v24 = vmul.f32 -1.442695, %v156_v23 }
  0xa5   :  { %820 = vpow2.f32 %v783_v24 }
  0xab   :  { %v821_v25 = vpop.eup %820 }
  0xac   :  { %v160_v26 = vadd.f32 1.0, %v821_v25 }
  0xae   :  { %822 = vrcp.f32 %v160_v26  ;;  %v172_v30 = vand.u32 2147483648, %v160_v26  ;;  %v170_v32 = vand.u32 2147483647, %v160_v26  ;;  %vm166_vm5 = vweird.f32 %v160_v26 }
  0xb0   :  { %v173_v34 = vor.u32 1.1754944e-38, %v172_v30  ;;  %vm171_vm7 = vcmp.eq.f32.partialorder %v170_v32, 8.507059e+37 }
  0xb4   :  { %v823_v27 = vpop.eup %822 }
  0xb5   :  { %v162_v28 = vmul.f32 %v823_v27, %v160_v26  ;;  %vm167_vm4 = vweird.f32 %v823_v27 }
  0xb6   :  { %vm168_vm6 = vmor %vm166_vm5, %vm167_vm4 }
  0xb7   :  { %v163_v29 = vsub.f32 1.0, %v162_v28 }
  0xb9   :  { %v164_v31 = vmul.f32 %v823_v27, %v163_v29 }
  0xbb   :  { %v165_v33 = vadd.f32 %v823_v27, %v164_v31 }
  0xbd   :  { %v169_v35 = vsel %vm168_vm6, %v823_v27, %v165_v33 }
  0xbe   :  { %v174_v36 = vsel %vm171_vm7, %v173_v34, %v169_v35 }
  0xbf   :  { %v176_v37 = vmul.f32 2.0, %v174_v36  ;;  %v178_v41 = vmul.f32 0.0, %v174_v36 }
  0xc1   :  { %v784_v38 = vadd.f32 -1.0, %v176_v37 }
  0xc3   :  { %180 = vrot.lane.b32.xlu0 %v784_v38, %s1004_s3 }
 0x135   :  { %v181_v39 = vpop.permute.xlu0 %180 }
 0x136   :  { %v183_v40 = vmul.f32 %v181_v39, %v174_v36 }
 0x138   :  { %185 = vrot.lane.b32.xlu0 %v183_v40, %s1005_s17 }
 0x1aa   :  { %v186_v42 = vpop.permute.xlu0 %185 }
 0x1ab   :  { %v188_v43 = vadd.f32 %v186_v42, %v178_v41 }
 0x1ad   :  { %824 = vtanh.f32 %v188_v43  ;;  %v249_v4 = vrot.slane %v188_v43, 7 }
 0x1b3   :  { %v825_v44 = vpop.eup %824 }
 0x1b4   :  { %191 = vrot.lane.b32.xlu1 %v825_v44, %s1004_s3 }
 0x226   :  { %v192_v45 = vpop.permute.xlu1 %191 }
 0x227   :  { %v194_v46 = vmul.f32 %v192_v45, %v174_v36 }
 0x229   :  { %196 = vrot.lane.b32.xlu1 %v194_v46, %s1005_s17 }
 0x29b   :  { %v197_v47 = vpop.permute.xlu1 %196 }
 0x29c   :  { %200 = vst.msk [vmem:[#allocation2] sm:$0x1] %vm199_vm8, %v197_v47  ;;  %785 = vmatmul.msk.f32.vlgmr.msra.gmra.mxu2 %vm94_vm3, %v197_v47 }
 0x31f   :  { %v220_v48 = vpop.f32.mrf.mxu2 }
 0x320   :  { %v224_v49 = vrot.slane %v220_v48, 7 }
 0x322   :  { %v226_v50 = vadd.f32 %v224_v49, %v1058_v21 }
 0x324   :  { %v786_v51 = vmul.f32 -1.442695, %v226_v50 }
 0x326   :  { %826 = vpow2.f32 %v786_v51 }
 0x32c   :  { %v827_v52 = vpop.eup %826 }
 0x32d   :  { %v230_v53 = vadd.f32 1.0, %v827_v52 }
 0x32f   :  { %828 = vrcp.f32 %v230_v53  ;;  %v242_v57 = vand.u32 2147483648, %v230_v53  ;;  %v240_v59 = vand.u32 2147483647, %v230_v53  ;;  %vm236_vm10 = vweird.f32 %v230_v53 }
 0x331   :  { %v243_v61 = vor.u32 1.1754944e-38, %v242_v57  ;;  %vm241_vm12 = vcmp.eq.f32.partialorder %v240_v59, 8.507059e+37 }
 0x335   :  { %v829_v54 = vpop.eup %828 }
 0x336   :  { %v232_v55 = vmul.f32 %v829_v54, %v230_v53  ;;  %vm237_vm9 = vweird.f32 %v829_v54 }
 0x337   :  { %vm238_vm11 = vmor %vm236_vm10, %vm237_vm9 }
 0x338   :  { %v233_v56 = vsub.f32 1.0, %v232_v55 }
 0x33a   :  { %v234_v58 = vmul.f32 %v829_v54, %v233_v56 }
 0x33c   :  { %v235_v60 = vadd.f32 %v829_v54, %v234_v58 }
 0x33e   :  { %v239_v62 = vsel %vm238_vm11, %v829_v54, %v235_v60 }
 0x33f   :  { %v244_v63 = vsel %vm241_vm12, %v243_v61, %v239_v62 }
 0x340   :  { %v246_v0 = vmul.f32 2.0, %v244_v63  ;;  %v251_v5 = vmul.f32 %v249_v4, %v244_v63 }
 0x342   :  { %v787_v1 = vadd.f32 -1.0, %v246_v0 }
 0x344   :  { %253 = vrot.lane.b32.xlu2 %v787_v1, %s1004_s3 }
 0x39e   :  { %v254_v2 = vpop.permute.xlu2 %253 }
 0x39f   :  { %v256_v3 = vmul.f32 %v254_v2, %v244_v63 }
 0x3a1   :  { %258 = vrot.lane.b32.xlu2 %v256_v3, %s1005_s17 }
 0x3fb   :  { %v259_v6 = vpop.permute.xlu2 %258 }
 0x3fc   :  { %v261_v7 = vadd.f32 %v259_v6, %v251_v5 }
 0x3fe   :  { %830 = vtanh.f32 %v261_v7  ;;  %v325_v34 = vrot.slane %v261_v7, 7 }
 0x404   :  { %v831_v8 = vpop.eup %830 }
 0x405   :  { %264 = vrot.lane.b32.xlu0 %v831_v8, %s1004_s3 }
 0x477   :  { %v265_v9 = vpop.permute.xlu0 %264 }
 0x478   :  { %v1070_v10 = vmul.f32 %v265_v9, %v244_v63 }
 0x47a   :  { %v274_v11 = vrot.slane %v1070_v10, 1 }
 0x47c   :  { %275 = vrot.lane.b32.xlu1 %v274_v11, %s1005_s17 }
 0x4ee   :  { %v276_v12 = vpop.permute.xlu1 %275 }
 0x4ef   :  { %788 = vmatmul.msk.f32.vlgmr.msra.gmra.mxu3 %vm94_vm3, %v276_v12 }
 0x572   :  { %v296_v13 = vpop.f32.mrf.mxu3 }
 0x573   :  { %v300_v14 = vrot.slane %v296_v13, 6 }
 0x575   :  { %v302_v15 = vadd.f32 %v300_v14, %v1058_v21 }
 0x577   :  { %v789_v16 = vmul.f32 -1.442695, %v302_v15 }
 0x579   :  { %832 = vpow2.f32 %v789_v16 }
 0x57f   :  { %v833_v17 = vpop.eup %832 }
 0x580   :  { %v306_v18 = vadd.f32 1.0, %v833_v17 }
 0x582   :  { %834 = vrcp.f32 %v306_v18  ;;  %v318_v23 = vand.u32 2147483648, %v306_v18  ;;  %v316_v25 = vand.u32 2147483647, %v306_v18  ;;  %vm312_vm14 = vweird.f32 %v306_v18 }
 0x584   :  { %v319_v27 = vor.u32 1.1754944e-38, %v318_v23  ;;  %vm317_vm0 = vcmp.eq.f32.partialorder %v316_v25, 8.507059e+37 }
 0x588   :  { %v835_v19 = vpop.eup %834 }
 0x589   :  { %v308_v20 = vmul.f32 %v835_v19, %v306_v18  ;;  %vm313_vm13 = vweird.f32 %v835_v19 }
 0x58a   :  { %vm314_vm15 = vmor %vm312_vm14, %vm313_vm13 }
 0x58b   :  { %v309_v22 = vsub.f32 1.0, %v308_v20 }
 0x58d   :  { %v310_v24 = vmul.f32 %v835_v19, %v309_v22 }
 0x58f   :  { %v311_v26 = vadd.f32 %v835_v19, %v310_v24 }
 0x591   :  { %v315_v28 = vsel %vm314_vm15, %v835_v19, %v311_v26 }
 0x592   :  { %v320_v29 = vsel %vm317_vm0, %v319_v27, %v315_v28 }
 0x593   :  { %v322_v30 = vmul.f32 2.0, %v320_v29  ;;  %v327_v35 = vmul.f32 %v325_v34, %v320_v29 }
 0x595   :  { %v790_v31 = vadd.f32 -1.0, %v322_v30 }
 0x597   :  { %329 = vrot.lane.b32.xlu2 %v790_v31, %s1004_s3 }
 0x5f1   :  { %v330_v32 = vpop.permute.xlu2 %329 }
 0x5f2   :  { %v332_v33 = vmul.f32 %v330_v32, %v320_v29 }
 0x5f4   :  { %334 = vrot.lane.b32.xlu0 %v332_v33, %s1005_s17 }
 0x666   :  { %v335_v36 = vpop.permute.xlu0 %334 }
 0x667   :  { %v337_v37 = vadd.f32 %v335_v36, %v327_v35 }
 0x669   :  { %836 = vtanh.f32 %v337_v37  ;;  %v401_v63 = vrot.slane %v337_v37, 7 }
 0x66f   :  { %v837_v38 = vpop.eup %836 }
 0x670   :  { %340 = vrot.lane.b32.xlu1 %v837_v38, %s1004_s3 }
 0x6e2   :  { %v341_v39 = vpop.permute.xlu1 %340 }
 0x6e3   :  { %v1079_v40 = vmul.f32 %v341_v39, %v320_v29 }
 0x6e5   :  { %v350_v41 = vrot.slane %v1079_v40, 2 }
 0x6e7   :  { %351 = vrot.lane.b32.xlu2 %v350_v41, %s1005_s17 }
 0x741   :  { %v352_v42 = vpop.permute.xlu2 %351 }
 0x742   :  { %791 = vmatmul.msk.f32.vlgmr.msrb.gmra.mxu0 %vm94_vm3, %v352_v42 }
 0x7bf   :  { %v372_v43 = vpop.f32.mrf.mxu0 }
 0x7c0   :  { %v376_v44 = vrot.slane %v372_v43, 5 }
 0x7c2   :  { %v378_v45 = vadd.f32 %v376_v44, %v1058_v21 }
 0x7c4   :  { %v792_v46 = vmul.f32 -1.442695, %v378_v45 }
 0x7c6   :  { %838 = vpow2.f32 %v792_v46 }
 0x7cc   :  { %v839_v47 = vpop.eup %838 }
 0x7cd   :  { %v382_v48 = vadd.f32 1.0, %v839_v47 }
 0x7cf   :  { %840 = vrcp.f32 %v382_v48  ;;  %v394_v52 = vand.u32 2147483648, %v382_v48  ;;  %v392_v54 = vand.u32 2147483647, %v382_v48  ;;  %vm388_vm2 = vweird.f32 %v382_v48 }
 0x7d1   :  { %v395_v56 = vor.u32 1.1754944e-38, %v394_v52  ;;  %vm393_vm5 = vcmp.eq.f32.partialorder %v392_v54, 8.507059e+37 }
 0x7d5   :  { %v841_v49 = vpop.eup %840 }
 0x7d6   :  { %v384_v50 = vmul.f32 %v841_v49, %v382_v48  ;;  %vm389_vm1 = vweird.f32 %v841_v49 }
 0x7d7   :  { %vm390_vm4 = vmor %vm388_vm2, %vm389_vm1 }
 0x7d8   :  { %v385_v51 = vsub.f32 1.0, %v384_v50 }
 0x7da   :  { %v386_v53 = vmul.f32 %v841_v49, %v385_v51 }
 0x7dc   :  { %v387_v55 = vadd.f32 %v841_v49, %v386_v53 }
 0x7de   :  { %v391_v57 = vsel %vm390_vm4, %v841_v49, %v387_v55 }
 0x7df   :  { %v396_v58 = vsel %vm393_vm5, %v395_v56, %v391_v57 }
 0x7e0   :  { %v398_v59 = vmul.f32 2.0, %v396_v58  ;;  %v403_v0 = vmul.f32 %v401_v63, %v396_v58 }
 0x7e2   :  { %v793_v60 = vadd.f32 -1.0, %v398_v59 }
 0x7e4   :  { %405 = vrot.lane.b32.xlu0 %v793_v60, %s1004_s3 }
 0x856   :  { %v406_v61 = vpop.permute.xlu0 %405 }
 0x857   :  { %v408_v62 = vmul.f32 %v406_v61, %v396_v58 }
 0x859   :  { %410 = vrot.lane.b32.xlu1 %v408_v62, %s1005_s17 }
 0x8cb   :  { %v411_v1 = vpop.permute.xlu1 %410 }
 0x8cc   :  { %v413_v2 = vadd.f32 %v411_v1, %v403_v0 }
 0x8ce   :  { %842 = vtanh.f32 %v413_v2  ;;  %v477_v30 = vrot.slane %v413_v2, 7 }
 0x8d4   :  { %v843_v3 = vpop.eup %842 }
 0x8d5   :  { %416 = vrot.lane.b32.xlu2 %v843_v3, %s1004_s3 }
 0x92f   :  { %v417_v4 = vpop.permute.xlu2 %416 }
 0x930   :  { %v1088_v5 = vmul.f32 %v417_v4, %v396_v58 }
 0x932   :  { %v426_v6 = vrot.slane %v1088_v5, 3 }
 0x934   :  { %427 = vrot.lane.b32.xlu0 %v426_v6, %s1005_s17 }
 0x9a6   :  { %v428_v7 = vpop.permute.xlu0 %427 }
 0x9a7   :  { %794 = vmatmul.msk.f32.vlgmr.msrb.gmra.mxu1 %vm94_vm3, %v428_v7 }
 0xa24   :  { %v448_v8 = vpop.f32.mrf.mxu1 }
 0xa25   :  { %v452_v9 = vrot.slane %v448_v8, 4 }
 0xa27   :  { %v454_v11 = vadd.f32 %v452_v9, %v1058_v21 }
 0xa29   :  { %v795_v12 = vmul.f32 -1.442695, %v454_v11 }
 0xa2b   :  { %844 = vpow2.f32 %v795_v12 }
 0xa31   :  { %v845_v13 = vpop.eup %844 }
 0xa32   :  { %v458_v14 = vadd.f32 1.0, %v845_v13 }
 0xa34   :  { %846 = vrcp.f32 %v458_v14  ;;  %v470_v18 = vand.u32 2147483648, %v458_v14  ;;  %v468_v20 = vand.u32 2147483647, %v458_v14  ;;  %vm464_vm7 = vweird.f32 %v458_v14 }
 0xa36   :  { %v471_v23 = vor.u32 1.1754944e-38, %v470_v18  ;;  %vm469_vm9 = vcmp.eq.f32.partialorder %v468_v20, 8.507059e+37 }
 0xa3a   :  { %v847_v15 = vpop.eup %846 }
 0xa3b   :  { %v460_v16 = vmul.f32 %v847_v15, %v458_v14  ;;  %vm465_vm6 = vweird.f32 %v847_v15 }
 0xa3c   :  { %vm466_vm8 = vmor %vm464_vm7, %vm465_vm6  ;;  %vm272_vm7 = vcmask 254977  }
 0xa3d   :  { %v461_v17 = vsub.f32 1.0, %v460_v16 }
 0xa3f   :  { %v462_v19 = vmul.f32 %v847_v15, %v461_v17 }
 0xa41   :  { %v463_v22 = vadd.f32 %v847_v15, %v462_v19 }
 0xa43   :  { %v467_v24 = vsel %vm466_vm8, %v847_v15, %v463_v22  ;;  %vm500_vm8 = vcmask 258052  }
 0xa44   :  { %v472_v25 = vsel %vm469_vm9, %v471_v23, %v467_v24  ;;  %vm348_vm9 = vcmask 256002  }
 0xa45   :  { %v474_v26 = vmul.f32 2.0, %v472_v25  ;;  %v479_v31 = vmul.f32 %v477_v30, %v472_v25 }
 0xa47   :  { %v796_v27 = vadd.f32 -1.0, %v474_v26 }
 0xa49   :  { %481 = vrot.lane.b32.xlu1 %v796_v27, %s1004_s3 }
 0xabb   :  { %v482_v28 = vpop.permute.xlu1 %481 }
 0xabc   :  { %v484_v29 = vmul.f32 %v482_v28, %v472_v25 }
 0xabe   :  { %486 = vrot.lane.b32.xlu2 %v484_v29, %s1005_s17 }
 0xb18   :  { %v487_v32 = vpop.permute.xlu2 %486 }
 0xb19   :  { %v489_v33 = vadd.f32 %v487_v32, %v479_v31 }
 0xb1b   :  { %848 = vtanh.f32 %v489_v33  ;;  %v553_v60 = vrot.slane %v489_v33, 7 }
 0xb21   :  { %v849_v34 = vpop.eup %848 }
 0xb22   :  { %492 = vrot.lane.b32.xlu0 %v849_v34, %s1004_s3 }
 0xb94   :  { %v493_v35 = vpop.permute.xlu0 %492 }
 0xb95   :  { %v1097_v36 = vmul.f32 %v493_v35, %v472_v25 }
 0xb97   :  { %v502_v37 = vrot.slane %v1097_v36, 4 }
 0xb99   :  { %503 = vrot.lane.b32.xlu1 %v502_v37, %s1005_s17 }
 0xc0b   :  { %v504_v38 = vpop.permute.xlu1 %503 }
 0xc0c   :  { %797 = vmatmul.msk.f32.vlgmr.msrb.gmra.mxu2 %vm94_vm3, %v504_v38 }
 0xc8f   :  { %v524_v39 = vpop.f32.mrf.mxu2 }
 0xc90   :  { %v528_v41 = vrot.slane %v524_v39, 3 }
 0xc92   :  { %v530_v42 = vadd.f32 %v528_v41, %v1058_v21 }
 0xc94   :  { %v798_v43 = vmul.f32 -1.442695, %v530_v42 }
 0xc96   :  { %850 = vpow2.f32 %v798_v43 }
 0xc9c   :  { %v851_v44 = vpop.eup %850 }
 0xc9d   :  { %v534_v45 = vadd.f32 1.0, %v851_v44 }
 0xc9f   :  { %852 = vrcp.f32 %v534_v45  ;;  %v546_v49 = vand.u32 2147483648, %v534_v45  ;;  %v544_v51 = vand.u32 2147483647, %v534_v45  ;;  %vm540_vm11 = vweird.f32 %v534_v45 }
 0xca1   :  { %v547_v53 = vor.u32 1.1754944e-38, %v546_v49  ;;  %vm545_vm13 = vcmp.eq.f32.partialorder %v544_v51, 8.507059e+37 }
 0xca5   :  { %v853_v46 = vpop.eup %852 }
 0xca6   :  { %v536_v47 = vmul.f32 %v853_v46, %v534_v45  ;;  %vm541_vm10 = vweird.f32 %v853_v46 }
 0xca7   :  { %vm542_vm12 = vmor %vm540_vm11, %vm541_vm10  ;;  %vm576_vm10 = vcmask 259077   ;;  %vm424_vm11 = vcmask 257027  }
 0xca8   :  { %v537_v48 = vsub.f32 1.0, %v536_v47 }
 0xcaa   :  { %v538_v50 = vmul.f32 %v853_v46, %v537_v48 }
 0xcac   :  { %v539_v52 = vadd.f32 %v853_v46, %v538_v50 }
 0xcae   :  { %v543_v54 = vsel %vm542_vm12, %v853_v46, %v539_v52  ;;  %vm652_vm12 = vcmask 260102  }
 0xcaf   :  { %v548_v55 = vsel %vm545_vm13, %v547_v53, %v543_v54  ;;  %vm728_vm13 = vcmask 261127  }
 0xcb0   :  { %v550_v56 = vmul.f32 2.0, %v548_v55  ;;  %v555_v61 = vmul.f32 %v553_v60, %v548_v55 }
 0xcb2   :  { %v799_v57 = vadd.f32 -1.0, %v550_v56 }
 0xcb4   :  { %557 = vrot.lane.b32.xlu2 %v799_v57, %s1004_s3 }
 0xd0e   :  { %v558_v58 = vpop.permute.xlu2 %557 }
 0xd0f   :  { %v560_v59 = vmul.f32 %v558_v58, %v548_v55 }
 0xd11   :  { %562 = vrot.lane.b32.xlu0 %v560_v59, %s1005_s17 }
 0xd83   :  { %v563_v62 = vpop.permute.xlu0 %562 }
 0xd84   :  { %v565_v63 = vadd.f32 %v563_v62, %v555_v61 }
 0xd86   :  { %854 = vtanh.f32 %v565_v63  ;;  %v629_v28 = vrot.slane %v565_v63, 7 }
 0xd8c   :  { %v855_v0 = vpop.eup %854 }
 0xd8d   :  { %568 = vrot.lane.b32.xlu1 %v855_v0, %s1004_s3 }
 0xdff   :  { %v569_v1 = vpop.permute.xlu1 %568 }
 0xe00   :  { %v1106_v2 = vmul.f32 %v569_v1, %v548_v55 }
 0xe02   :  { %v578_v3 = vrot.slane %v1106_v2, 5 }
 0xe04   :  { %579 = vrot.lane.b32.xlu2 %v578_v3, %s1005_s17 }
 0xe5e   :  { %v580_v4 = vpop.permute.xlu2 %579 }
 0xe5f   :  { %800 = vmatmul.msk.f32.vlgmr.msrb.gmra.mxu3 %vm94_vm3, %v580_v4  ;;  %v734_v4 = vld [vmem:[#allocation9 + $0x18] sm:$0xff] }
 0xe60   :  { %754 = vmatpush.msra.mxu1 %v734_v4 }
 0xee2   :  { %v600_v6 = vpop.f32.mrf.mxu3 }
 0xee3   :  { %v604_v7 = vrot.slane %v600_v6, 2  ;;  %v733_v6 = vld [vmem:[#allocation9 + $0x10] sm:$0xff] }
 0xee4   :  { %755 = vmatpush.msra.mxu1 %v733_v6 }
 0xee5   :  { %v606_v8 = vadd.f32 %v604_v7, %v1058_v21  ;;  %v732_v7 = vld [vmem:[#allocation9 + $0x8] sm:$0xff] }
 0xee6   :  { %756 = vmatpush.msra.mxu1 %v732_v7 }
 0xee7   :  { %v801_v9 = vmul.f32 -1.442695, %v606_v8  ;;  %v731_v8 = vld [vmem:[#allocation9] sm:$0xff] }
 0xee8   :  { %757 = vmatpush.msra.mxu1 %v731_v8 }
 0xee9   :  { %856 = vpow2.f32 %v801_v9 }
 0xeef   :  { %v857_v11 = vpop.eup %856 }
 0xef0   :  { %v610_v12 = vadd.f32 1.0, %v857_v11  ;;  %v819_v11 = vld [vmem:[%s1145_s5] ss:$0 sm:$0xff] }
 0xef2   :  { %858 = vrcp.f32 %v610_v12  ;;  %v622_v16 = vand.u32 2147483648, %v610_v12  ;;  %v620_v18 = vand.u32 2147483647, %v610_v12  ;;  %vm616_vm15 = vweird.f32 %v610_v12 }
 0xef4   :  { %v623_v20 = vor.u32 1.1754944e-38, %v622_v16  ;;  %vm621_vm1 = vcmp.eq.f32.partialorder %v620_v18, 8.507059e+37 }
 0xef8   :  { %v859_v13 = vpop.eup %858 }
 0xef9   :  { %v612_v14 = vmul.f32 %v859_v13, %v610_v12  ;;  %vm617_vm14 = vweird.f32 %v859_v13 }
 0xefa   :  { %vm618_vm0 = vmor %vm616_vm15, %vm617_vm14 }
 0xefb   :  { %v613_v15 = vsub.f32 1.0, %v612_v14 }
 0xefd   :  { %v614_v17 = vmul.f32 %v859_v13, %v613_v15 }
 0xeff   :  { %v615_v19 = vadd.f32 %v859_v13, %v614_v17 }
 0xf01   :  { %v619_v22 = vsel %vm618_vm0, %v859_v13, %v615_v19 }
 0xf02   :  { %v624_v23 = vsel %vm621_vm1, %v623_v20, %v619_v22 }
 0xf03   :  { %v626_v24 = vmul.f32 2.0, %v624_v23  ;;  %v631_v29 = vmul.f32 %v629_v28, %v624_v23 }
 0xf05   :  { %v802_v25 = vadd.f32 -1.0, %v626_v24 }
 0xf07   :  { %633 = vrot.lane.b32.xlu0 %v802_v25, %s1004_s3 }
 0xf79   :  { %v634_v26 = vpop.permute.xlu0 %633 }
 0xf7a   :  { %v636_v27 = vmul.f32 %v634_v26, %v624_v23 }
 0xf7c   :  { %638 = vrot.lane.b32.xlu1 %v636_v27, %s1005_s17 }
 0xfee   :  { %v639_v30 = vpop.permute.xlu1 %638 }
 0xfef   :  { %v641_v31 = vadd.f32 %v639_v30, %v631_v29 }
 0xff1   :  { %860 = vtanh.f32 %v641_v31 }
 0xff7   :  { %v861_v32 = vpop.eup %860 }
 0xff8   :  { %644 = vrot.lane.b32.xlu2 %v861_v32, %s1004_s3 }
0x1052   :  { %v645_v33 = vpop.permute.xlu2 %644 }
0x1053   :  { %v647_v34 = vmul.f32 %v645_v33, %v624_v23 }
0x1055   :  { %v654_v35 = vrot.slane %v647_v34, 6 }
0x1057   :  { %655 = vrot.lane.b32.xlu0 %v654_v35, %s1005_s17 }
0x10c9   :  { %v656_v37 = vpop.permute.xlu0 %655 }
0x10ca   :  { %803 = vmatmul.msk.f32.vlgmr.msra.gmra.mxu0 %vm94_vm3, %v656_v37 }
0x1147   :  { %v676_v38 = vpop.f32.mrf.mxu0 }
0x1148   :  { %v680_v39 = vrot.slane %v676_v38, 1 }
0x114a   :  { %v682_v41 = vadd.f32 %v680_v39, %v1058_v21 }
0x114c   :  { %v804_v42 = vmul.f32 -1.442695, %v682_v41 }
0x114e   :  { %862 = vpow2.f32 %v804_v42 }
0x1154   :  { %v863_v43 = vpop.eup %862 }
0x1155   :  { %v686_v44 = vadd.f32 1.0, %v863_v43 }
0x1157   :  { %864 = vrcp.f32 %v686_v44  ;;  %v698_v48 = vand.u32 2147483648, %v686_v44  ;;  %v696_v50 = vand.u32 2147483647, %v686_v44  ;;  %vm692_vm4 = vweird.f32 %v686_v44 }
0x1159   :  { %v699_v52 = vor.u32 1.1754944e-38, %v698_v48  ;;  %vm697_vm6 = vcmp.eq.f32.partialorder %v696_v50, 8.507059e+37 }
0x115d   :  { %v865_v45 = vpop.eup %864 }
0x115e   :  { %v688_v46 = vmul.f32 %v865_v45, %v686_v44  ;;  %vm693_vm2 = vweird.f32 %v865_v45 }
0x115f   :  { %vm694_vm5 = vmor %vm692_vm4, %vm693_vm2 }
0x1160   :  { %v689_v47 = vsub.f32 1.0, %v688_v46 }
0x1162   :  { %v690_v49 = vmul.f32 %v865_v45, %v689_v47 }
0x1164   :  { %v691_v51 = vadd.f32 %v865_v45, %v690_v49 }
0x1166   :  { %v695_v53 = vsel %vm694_vm5, %v865_v45, %v691_v51 }
0x1167   :  { %v700_v54 = vsel %vm697_vm6, %v699_v52, %v695_v53 }
0x1168   :  { %v702_v21 = vmul.f32 2.0, %v700_v54 }
0x116a   :  { %v805_v55 = vadd.f32 -1.0, %v702_v21 }
0x116c   :  { %709 = vrot.lane.b32.xlu1 %v805_v55, %s1004_s3 }
0x1174   :  { %269 = vrot.lane.b32.xlu1 %v1070_v10, %s1005_s17  ;;  %v705_v10 = vrot.slane %v641_v31, 7 }
0x1176   :  { %v707_v60 = vmul.f32 %v705_v10, %v700_v54 }
0x117c   :  { %497 = vrot.lane.b32.xlu1 %v1097_v36, %s1005_s17 }
0x11de   :  { %v710_v56 = vpop.permute.xlu1 %709 }
0x11df   :  { %v712_v57 = vmul.f32 %v710_v56, %v700_v54 }
0x11e1   :  { %714 = vrot.lane.b32.xlu2 %v712_v57, %s1005_s17 }
0x11e6   :  { %v270_v58 = vpop.permute.xlu1 %269 }
0x11e7   :  { %273 = vst.msk [vmem:[#allocation2] sm:$0x2] %vm272_vm7, %v270_v58 }
0x11e9   :  { %345 = vrot.lane.b32.xlu2 %v1079_v40, %s1005_s17 }
0x11ee   :  { %v498_v59 = vpop.permute.xlu1 %497 }
0x11ef   :  { %501 = vst.msk [vmem:[#allocation2] sm:$0x10] %vm500_vm8, %v498_v59 }
0x11f1   :  { %573 = vrot.lane.b32.xlu2 %v1106_v2, %s1005_s17 }
0x123b   :  { %v715_v61 = vpop.permute.xlu2 %714 }
0x123c   :  { %v717_v36 = vadd.f32 %v715_v61, %v707_v60 }
0x123e   :  { %866 = vtanh.f32 %v717_v36 }
0x1243   :  { %v346_v62 = vpop.permute.xlu2 %345 }
0x1244   :  { %v867_v63 = vpop.eup %866  ;;  %349 = vst.msk [vmem:[#allocation2] sm:$0x4] %vm348_vm9, %v346_v62 }
0x1245   :  { %720 = vrot.lane.b32.xlu0 %v867_v63, %s1004_s3 }
0x124b   :  { %v574_v0 = vpop.permute.xlu2 %573 }
0x124c   :  { %577 = vst.msk [vmem:[#allocation2] sm:$0x20] %vm576_vm10, %v574_v0 }
0x124d   :  { %421 = vrot.lane.b32.xlu0 %v1088_v5, %s1005_s17 }
0x1255   :  { %649 = vrot.lane.b32.xlu0 %v647_v34, %s1005_s17 }
0x12b7   :  { %v721_v40 = vpop.permute.xlu0 %720 }
0x12b8   :  { %v723_v1 = vmul.f32 %v721_v40, %v700_v54 }
0x12ba   :  { %725 = vrot.lane.b32.xlu1 %v723_v1, %s1005_s17 }
0x12bf   :  { %v422_v2 = vpop.permute.xlu0 %421 }
0x12c0   :  { %425 = vst.msk [vmem:[#allocation2] sm:$0x8] %vm424_vm11, %v422_v2 }
0x12c7   :  { %v650_v3 = vpop.permute.xlu0 %649 }
0x12c8   :  { %653 = vst.msk [vmem:[#allocation2] sm:$0x40] %vm652_vm12, %v650_v3 }
0x132c   :  { %v726_v5 = vpop.permute.xlu1 %725 }
0x132d   :  { %729 = vst.msk [vmem:[#allocation2] sm:$0x80] %vm728_vm13, %v726_v5 }
0x1334   :  { %v730_v9 = vld [vmem:[#allocation2] sm:$0xff] }
0x1335   :  { %806 = vmatmul.msk.f32.vlgmr.msra.gmra.mxu1 %vm94_vm3, %v730_v9 }
0x13b2   :  { %v759_v12 = vpop.f32.mrf.mxu1 }
0x13b3   :  { %v760_v13 = vadd.f32 %v819_v11, %v759_v12 }
0x13b5   :  { %762 = vst [vmem:[#allocation11] sm:$0xff] %v760_v13 }
0x13b6   :  { %773 = dma.vmem_to_hbm [thread:$0]  %s769_s21, 128, %s771_s24, [#allocation5]  }
0x13b7   :  { %994 = dma.done.wait [#allocation5], 128  }
0x13b8   :  { %995 = vsyncadd [#allocation5], 4294967168 }
0x13b9   :  { %778 = vsyncpa [#allocation4], 1 }
0x13ba   :  { %779 = vsyncpa [#allocation7], 1 }
0x13bb   :  { %780 = vsyncpa [#allocation10], 1 }
0x13bc   :  { %781 = vsyncpa [#allocation5], 1 }

</bundles_post_ra>
